<compile_context>
chip_gen: v7x
topology: tpu7x:2x2x1
jax: 0.10.0
libtpu: 0.0.40
codegen_flags: <defaults>
</compile_context>

<pallas_src>
import functools

import jax
import jax.numpy as jnp
from jax.experimental import pallas as pl
from jax.experimental.pallas import tpu as pltpu


def _round_up(n: int, m: int) -> int:
    return ((n + m - 1) // m) * m


def ddpg_qnet_kernel(x_ref, w0_ref, b0_ref, w1_ref, b1_ref, w2_ref, b2_ref, o_ref):
    # fc0 + tanh  (bf16 MXU matmul, f32 accumulate, f32 tanh)
    x = x_ref[...].astype(jnp.bfloat16)
    h0 = jnp.dot(x, w0_ref[...], preferred_element_type=jnp.float32) + b0_ref[...]
    h0 = jnp.tanh(h0)

    # fc1 + tanh
    h1 = (
        jnp.dot(h0.astype(jnp.bfloat16), w1_ref[...],
                preferred_element_type=jnp.float32)
        + b1_ref[...]
    )
    h1 = jnp.tanh(h1)

    # fc2 (out_features == 1): VPU multiply + lane reduce instead of an MXU
    # matmul with a single useful result column.
    q = jnp.sum(h1 * w2_ref[...], axis=-1, keepdims=True) + b2_ref[...]
    o_ref[...] = q.astype(o_ref.dtype)


def prepare_params(params):
    """Convert f32 (in, out) params into the kernel layout.

    fc0/fc1 weights -> bf16 (MXU inputs); fc2 weight -> f32 (1, 128) row for
    the VPU reduce; biases stay f32 row vectors.
    """
    w0, b0, w1, b1, w2, b2 = params
    return (
        w0.astype(jnp.bfloat16),
        b0.astype(jnp.float32),
        w1.astype(jnp.bfloat16),
        b1.astype(jnp.float32),
        jnp.reshape(w2, (1, -1)).astype(jnp.float32),   # (128, 1) -> (1, 128)
        jnp.reshape(b2, (1, 1)).astype(jnp.float32),
    )


@functools.partial(jax.jit, static_argnames=("block_b",))
def ddpg_qnet_forward(x, kernel_params, block_b: int = 256):
    """x: (B, state_dim + action_dim) float32. Returns (B, 1) float32."""
    w0, b0, w1, b1, w2_row, b2 = kernel_params
    B, din = x.shape
    d0 = w0.shape[1]   # 256
    d1 = w1.shape[1]   # 128

    # Batch tile: multiple of 8 sublanes; cap at block_b. Pad B up to a
    # multiple of the tile (padded rows are sliced off at the end).
    tb = min(block_b, _round_up(B, 8))
    b_padded = _round_up(B, tb)
    if b_padded != B:
        x = jnp.pad(x, ((0, b_padded - B), (0, 0)))
    grid = (b_padded // tb,)

    param_bytes = sum(int(p.size) * p.dtype.itemsize
                      for p in (w0, b0, w1, b1, w2_row, b2))
    cost = pl.CostEstimate(
        flops=2 * b_padded * (din * d0 + d0 * d1 + d1),
        transcendentals=b_padded * (d0 + d1),
        bytes_accessed=int(x.size) * 4 + param_bytes + b_padded * 4,
    )

    out = pl.pallas_call(
        ddpg_qnet_kernel,
        out_shape=jax.ShapeDtypeStruct((b_padded, 1), jnp.float32),
        grid=grid,
        in_specs=[
            pl.BlockSpec((tb, din), lambda i: (i, 0)),   # x: tiled over batch
            pl.BlockSpec((din, d0), lambda i: (0, 0)),   # w0: resident
            pl.BlockSpec((1, d0), lambda i: (0, 0)),     # b0
            pl.BlockSpec((d0, d1), lambda i: (0, 0)),    # w1
            pl.BlockSpec((1, d1), lambda i: (0, 0)),     # b1
            pl.BlockSpec((1, d1), lambda i: (0, 0)),     # w2 as (1, 128) row
            pl.BlockSpec((1, 1), lambda i: (0, 0)),      # b2
        ],
        out_specs=pl.BlockSpec((tb, 1), lambda i: (i, 0)),
        compiler_params=pltpu.CompilerParams(
            dimension_semantics=("parallel",),
        ),
        cost_estimate=cost,
    )(x, w0, b0, w1, b1, w2_row, b2)
    return out[:B]


def init_params(key, state_dim, action_dim):
    """Deterministic init matching the shapes of DDPGQNet.__init__.

    PyTorch Linear stores weight as (out, in); we keep (in, out) for the
    kernel (mathematically the transpose), preserving forward semantics.
    """
    in0 = state_dim + action_dim
    dims = [(in0, 256), (256, 128), (128, 1)]
    keys = jax.random.split(key, 6)
    params = []
    for i, (din, dout) in enumerate(dims):
        bound = 1.0 / jnp.sqrt(jnp.float32(din))  # PyTorch default uniform bound
        w = jax.random.uniform(keys[2 * i], (din, dout), jnp.float32, -bound, bound)
        b = jax.random.uniform(keys[2 * i + 1], (1, dout), jnp.float32, -bound, bound)
        params += [w, b]
    return tuple(params)


if __name__ == "__main__":
    state_dim, action_dim = 12, 4
    batch = 8

    key = jax.random.PRNGKey(0)
    kx, kp = jax.random.split(key)
    x = jax.random.normal(kx, (batch, state_dim + action_dim), jnp.float32)
    params = init_params(kp, state_dim, action_dim)
    kparams = prepare_params(params)

    out = ddpg_qnet_forward(x, kparams)
    jax.block_until_ready(out)
    assert out.shape == (batch, 1)

    # Reference 1: plain-JAX f32 forward (same math as the PyTorch module).
    w0, b0, w1, b1, w2, b2 = params
    ref_f32 = jnp.tanh(x @ w0 + b0)
    ref_f32 = jnp.tanh(ref_f32 @ w1 + b1)
    ref_f32 = ref_f32 @ w2 + b2
    assert jnp.allclose(out, ref_f32, atol=5e-2, rtol=0.0), "f32 reference mismatch"

    # Reference 2: same bf16 weight quantization as the kernel -> tight check.
    w0b, b0k, w1b, b1k, w2r, b2k = kparams
    ref_bf = jnp.tanh(x.astype(jnp.bfloat16) @ w0b + b0k)
    ref_bf = jnp.tanh(ref_bf.astype(jnp.bfloat16) @ w1b + b1k)
    ref_bf = jnp.sum(ref_bf * w2r, axis=-1, keepdims=True) + b2k
    assert jnp.allclose(out, ref_bf, atol=1e-3, rtol=1e-3), "bf16 reference mismatch"

    print("KERNEL_OK")
</pallas_src>

<mosaic_0001>
module attributes {stable_mosaic.version = 11 : i64} {
  func.func @ddpg_qnet_kernel(%arg0: i32, %arg1: memref<8x16xf32, #tpu.memory_space<vmem>>, %arg2: memref<16x256xbf16, #tpu.memory_space<vmem>>, %arg3: memref<1x256xf32, #tpu.memory_space<vmem>>, %arg4: memref<256x128xbf16, #tpu.memory_space<vmem>>, %arg5: memref<1x128xf32, #tpu.memory_space<vmem>>, %arg6: memref<1x128xf32, #tpu.memory_space<vmem>>, %arg7: memref<1x1xf32, #tpu.memory_space<vmem>>, %arg8: memref<8x1xf32, #tpu.memory_space<vmem>>) attributes {dimension_semantics = [#tpu.dimension_semantics<parallel>], iteration_bounds = array<i64: 1>, scalar_prefetch = 0 : i64, scratch_operands = 0 : i64, tpu.core_type = #tpu.core_type<tc>, window_params = [{transform_indices = @transform_0, window_bounds = array<i64: 8, 16>}, {pipeline_mode = #tpu.pipeline_mode<synchronous>, transform_indices = @transform_1, window_bounds = array<i64: 16, 256>}, {pipeline_mode = #tpu.pipeline_mode<synchronous>, transform_indices = @transform_2, window_bounds = array<i64: 1, 256>}, {pipeline_mode = #tpu.pipeline_mode<synchronous>, transform_indices = @transform_3, window_bounds = array<i64: 256, 128>}, {pipeline_mode = #tpu.pipeline_mode<synchronous>, transform_indices = @transform_4, window_bounds = array<i64: 1, 128>}, {pipeline_mode = #tpu.pipeline_mode<synchronous>, transform_indices = @transform_5, window_bounds = array<i64: 1, 128>}, {pipeline_mode = #tpu.pipeline_mode<synchronous>, transform_indices = @transform_6, window_bounds = array<i64: 1, 1>}, {transform_indices = @transform_7, window_bounds = array<i64: 8, 1>}]} {
    %c0 = arith.constant 0 : index
    %c0_0 = arith.constant 0 : index
    %0 = vector.load %arg1[%c0, %c0_0] : memref<8x16xf32, #tpu.memory_space<vmem>>, vector<8x16xf32>
    %1 = arith.truncf %0 : vector<8x16xf32> to vector<8x16xbf16>
    %c0_1 = arith.constant 0 : index
    %c0_2 = arith.constant 0 : index
    %2 = vector.load %arg2[%c0_1, %c0_2] : memref<16x256xbf16, #tpu.memory_space<vmem>>, vector<16x256xbf16>
    %cst = arith.constant dense<0.000000e+00> : vector<8x256xf32>
    %3 = tpu.matmul %1, %2, %cst {dimension_numbers = #tpu.dot_dimension_numbers<[1], [0], [0], [1], [0, 0, 1, 1], [], []>} : vector<8x16xbf16>, vector<16x256xbf16>, vector<8x256xf32> -> vector<8x256xf32>
    %c0_3 = arith.constant 0 : index
    %c0_4 = arith.constant 0 : index
    %4 = vector.load %arg3[%c0_3, %c0_4] : memref<1x256xf32, #tpu.memory_space<vmem>>, vector<1x256xf32>
    %5 = vector.broadcast %4 : vector<1x256xf32> to vector<8x256xf32>
    %6 = arith.addf %3, %5 : vector<8x256xf32>
    %7 = math.tanh %6 : vector<8x256xf32>
    %8 = arith.truncf %7 : vector<8x256xf32> to vector<8x256xbf16>
    %c0_5 = arith.constant 0 : index
    %c0_6 = arith.constant 0 : index
    %9 = vector.load %arg4[%c0_5, %c0_6] : memref<256x128xbf16, #tpu.memory_space<vmem>>, vector<256x128xbf16>
    %cst_7 = arith.constant dense<0.000000e+00> : vector<8x128xf32>
    %10 = tpu.matmul %8, %9, %cst_7 {dimension_numbers = #tpu.dot_dimension_numbers<[1], [0], [0], [1], [0, 0, 1, 1], [], []>} : vector<8x256xbf16>, vector<256x128xbf16>, vector<8x128xf32> -> vector<8x128xf32>
    %c0_8 = arith.constant 0 : index
    %c0_9 = arith.constant 0 : index
    %11 = vector.load %arg5[%c0_8, %c0_9] : memref<1x128xf32, #tpu.memory_space<vmem>>, vector<1x128xf32>
    %12 = vector.broadcast %11 : vector<1x128xf32> to vector<8x128xf32>
    %13 = arith.addf %10, %12 : vector<8x128xf32>
    %14 = math.tanh %13 : vector<8x128xf32>
    %c0_10 = arith.constant 0 : index
    %c0_11 = arith.constant 0 : index
    %15 = vector.load %arg6[%c0_10, %c0_11] : memref<1x128xf32, #tpu.memory_space<vmem>>, vector<1x128xf32>
    %16 = vector.broadcast %15 : vector<1x128xf32> to vector<8x128xf32>
    %17 = arith.mulf %14, %16 : vector<8x128xf32>
    %cst_12 = arith.constant dense<0.000000e+00> : vector<8xf32>
    %18 = vector.multi_reduction <add>, %17, %cst_12 [1] : vector<8x128xf32> to vector<8xf32>
    %19 = vector.shape_cast %18 : vector<8xf32> to vector<8x1xf32>
    %c0_13 = arith.constant 0 : index
    %c0_14 = arith.constant 0 : index
    %20 = vector.load %arg7[%c0_13, %c0_14] : memref<1x1xf32, #tpu.memory_space<vmem>>, vector<1x1xf32>
    %21 = vector.broadcast %20 : vector<1x1xf32> to vector<8x1xf32>
    %22 = arith.addf %19, %21 : vector<8x1xf32>
    %c0_15 = arith.constant 0 : index
    %c0_16 = arith.constant 0 : index
    %23 = vector.load %arg8[%c0_15, %c0_16] : memref<8x1xf32, #tpu.memory_space<vmem>>, vector<8x1xf32>
    tpu.vector_store %arg8[%c0_15, %c0_16], %22 {strides = array<i32>} : memref<8x1xf32, #tpu.memory_space<vmem>>, vector<8x1xf32>,
    return
  }
  func.func @transform_0(%arg0: i32) -> (i32, i32) {
    %c0_i32 = arith.constant 0 : i32
    %c0_i32_0 = arith.constant 0 : i32
    return %arg0, %c0_i32 : i32, i32
  }
  func.func @transform_1(%arg0: i32) -> (i32, i32) {
    %c0_i32 = arith.constant 0 : i32
    %c0_i32_0 = arith.constant 0 : i32
    %c0_i32_1 = arith.constant 0 : i32
    return %c0_i32, %c0_i32_0 : i32, i32
  }
  func.func @transform_2(%arg0: i32) -> (i32, i32) {
    %c0_i32 = arith.constant 0 : i32
    %c0_i32_0 = arith.constant 0 : i32
    %c0_i32_1 = arith.constant 0 : i32
    return %c0_i32, %c0_i32_0 : i32, i32
  }
  func.func @transform_3(%arg0: i32) -> (i32, i32) {
    %c0_i32 = arith.constant 0 : i32
    %c0_i32_0 = arith.constant 0 : i32
    %c0_i32_1 = arith.constant 0 : i32
    return %c0_i32, %c0_i32_0 : i32, i32
  }
  func.func @transform_4(%arg0: i32) -> (i32, i32) {
    %c0_i32 = arith.constant 0 : i32
    %c0_i32_0 = arith.constant 0 : i32
    %c0_i32_1 = arith.constant 0 : i32
    return %c0_i32, %c0_i32_0 : i32, i32
  }
  func.func @transform_5(%arg0: i32) -> (i32, i32) {
    %c0_i32 = arith.constant 0 : i32
    %c0_i32_0 = arith.constant 0 : i32
    %c0_i32_1 = arith.constant 0 : i32
    return %c0_i32, %c0_i32_0 : i32, i32
  }
  func.func @transform_6(%arg0: i32) -> (i32, i32) {
    %c0_i32 = arith.constant 0 : i32
    %c0_i32_0 = arith.constant 0 : i32
    %c0_i32_1 = arith.constant 0 : i32
    return %c0_i32, %c0_i32_0 : i32, i32
  }
  func.func @transform_7(%arg0: i32) -> (i32, i32) {
    %c0_i32 = arith.constant 0 : i32
    %c0_i32_0 = arith.constant 0 : i32
    return %arg0, %c0_i32 : i32, i32
  }
}

</mosaic_0001>

<bundles_post_ra>
// kernel: ddpg_qnet_forward.1
= control target key start
LH: loop header
LB: loop body
LE: loop exit
PB: predicated region body
PF: predicated region fallthrough
CT: control target
= control target key end

     0   :  { %s591_s0 = inlined_call_operand.hbm [shape: f32[8,16], index: 0, kind: input, shape index: {}]   ;;  %s592_s1 = inlined_call_operand.hbm [shape: bf16[16,256], index: 1, kind: input, shape index: {}]   ;;  %s593_s2 = inlined_call_operand.vmem [shape: f32[1,256], index: 2, kind: input, shape index: {}]   ;;  %s594_s3 = inlined_call_operand.hbm [shape: bf16[256,128], index: 3, kind: input, shape index: {}]   ;;  %s595_s4 = inlined_call_operand.vmem [shape: f32[1,128], index: 4, kind: input, shape index: {}]   ;;  %s596_s5 = inlined_call_operand.vmem [shape: f32[1,128], index: 5, kind: input, shape index: {}]   ;;  %s597_s6 = inlined_call_operand.<no memory space> [shape: f32[1,1], index: 6, kind: input, shape index: {}]   ;;  %s598_s7 = inlined_call_operand.vmem [shape: f32[8,1], index: 7, kind: output, shape index: {}]  }
   0x1   :  { %v12_v0 = vstv %s597_s6 }
   0x2   :  { %13 = vst [vmem:[#allocation2] sm:$0x1] %v12_v0 }
   0x3   :  { %14 = vsyncpa [#allocation4], 0 }
   0x4   :  { %15 = vsyncpa [#allocation6], 0  ;;  %s492_s26 = smov [#allocation5]   ;;  %s422_s30 = scalar_lea.hbm %s592_s1, 256 }
   0x5   :  { %s31_s27 = sshll.u32 %s492_s26, 4  ;;  %p423_p0 = scmp.ne.s32.totalorder %s592_s1, %s422_s30  ;;  %s32_s27 = int_to_ptr.vmem [resolvable:$true] %s31_s27 }
   0x6   :  { %p426_p1 = scmp.lt.u32.totalorder %s422_s30, %s592_s1 }
   0x8   :  { %p428_p2 = pnand %p426_p1, %p423_p0 }
   0xa   :  { %431 = shalt.err (!%p428_p2)
}
   0xb   :  { %s432_s6 = scalar_lea.vmem %s32_s27, 256  ;;  %p437_p4 = scmp.lt.s32.totalorder %s32_s27, %s32_s27 }
   0xc   :  { %p433_p3 = scmp.ne.s32.totalorder %s32_s27, %s432_s6  ;;  %p438_p5 = scmp.lt.s32.totalorder %s432_s6, %s432_s6 }
   0xe   :  { %p439_p6 = por %p438_p5, %p437_p4 }
  0x10   :  { %p440_p7 = pnand %p439_p6, %p433_p3 }
  0x12   :  { %443 = shalt.err (!%p440_p7)
}
  0x13   :  { %s493_s12 = smov 128   ;;  %s494_s13 = smov 8  }
  0x14   :  { %37 = dma.hbm_to_vmem [thread:$0]  %s592_s1, 256, %s32_s27, [#allocation6], %s493_s12, %s493_s12, %s494_s13  }
  0x15   :  { %s495_s16 = smov [#allocation3]   ;;  %s496_s18 = smov [#allocation7]  }
  0x16   :  { %s22_s17 = sshll.u32 %s495_s16, 4  ;;  %s45_s19 = sshll.u32 %s496_s18, 4  ;;  %s23_s17 = int_to_ptr.vmem [resolvable:$true] %s22_s17  ;;  %s46_s19 = int_to_ptr.vmem [resolvable:$true] %s45_s19 }
  0x17   :  { %s444_s22 = scalar_lea.hbm %s591_s0, 128 }
  0x18   :  { %p445_p8 = scmp.ne.s32.totalorder %s591_s0, %s444_s22  ;;  %p448_p9 = scmp.lt.u32.totalorder %s444_s22, %s591_s0 }
  0x1a   :  { %p450_p10 = pnand %p448_p9, %p445_p8 }
  0x1c   :  { %453 = shalt.err (!%p450_p10)
}
  0x1d   :  { %s454_s1 = scalar_lea.vmem %s23_s17, 128  ;;  %p459_p12 = scmp.lt.s32.totalorder %s23_s17, %s23_s17 }
  0x1e   :  { %p455_p11 = scmp.ne.s32.totalorder %s23_s17, %s454_s1  ;;  %p460_p13 = scmp.lt.s32.totalorder %s454_s1, %s454_s1 }
  0x20   :  { %p461_p0 = por %p460_p13, %p459_p12 }
  0x22   :  { %p462_p1 = pnand %p461_p0, %p455_p11 }
  0x24   :  { %465 = shalt.err (!%p462_p1)
}
  0x25   :  { %25 = dma.hbm_to_vmem [thread:$0]  %s591_s0, 128, %s23_s17, [#allocation4]  }
  0x26   :  { %s466_s8 = scalar_lea.hbm %s594_s3, 2048 }
  0x27   :  { %p467_p2 = scmp.ne.s32.totalorder %s594_s3, %s466_s8  ;;  %p470_p3 = scmp.lt.u32.totalorder %s466_s8, %s594_s3 }
  0x29   :  { %p472_p4 = pnand %p470_p3, %p467_p2 }
  0x2b   :  { %475 = shalt.err (!%p472_p4)
}
  0x2c   :  { %s476_s12 = scalar_lea.vmem %s46_s19, 2048  ;;  %p481_p6 = scmp.lt.s32.totalorder %s46_s19, %s46_s19 }
  0x2d   :  { %p477_p5 = scmp.ne.s32.totalorder %s46_s19, %s476_s12  ;;  %p482_p7 = scmp.lt.s32.totalorder %s476_s12, %s476_s12 }
  0x2f   :  { %p483_p8 = por %p482_p7, %p481_p6 }
  0x31   :  { %p484_p9 = pnand %p483_p8, %p477_p5 }
  0x33   :  { %487 = shalt.err (!%p484_p9)
}
  0x34   :  { %s497_s0 = smov 64   ;;  %s498_s13 = smov 4  }
  0x35   :  { %51 = dma.hbm_to_vmem [thread:$0]  %s594_s3, 2048, %s46_s19, [#allocation6], %s497_s0, %s497_s0, %s498_s13  }
  0x36   :  { %488 = dma.done.wait [#allocation4], 128  }
  0x37   :  { %489 = vsyncadd [#allocation4], 4294967168 }
  0x38   :  { %490 = dma.done.wait [#allocation6], 2304  }
  0x39   :  { %491 = vsyncadd [#allocation6], 4294964992  ;;  %v499_v1 = vmov 0   ;;  %v397_v2 = vld [vmem:[#allocation5 + $0x4] ss:$8 sps:$4 sm:$0xff]   ;;  %v68_v4 = vld [vmem:[#allocation3] sm:$0xff]  ;;  %v74_v22 = vlaneseq }
  0x3a   :  { %130 = vmatprep.mubr.bf16.mxu0 %v499_v1  ;;  %v399_v3 = vld [vmem:[#allocation5] ss:$8 sps:$4 sm:$0xff]   ;;  %98 = vmatprep.subr.bf16.mxu0 %v397_v2  ;;  %v69_v5 = vpack.c.bf16 %v68_v4, %v68_v4  ;;  %v400_v6 = vld [vmem:[#allocation7 + $0x40] sm:$0xff]   ;;  %vm94_vm0 = vcmask 130048   ;;  %v402_v8 = vld [vmem:[#allocation7 + $0x48] sm:$0xff]   ;;  %vm337_vm1 = vcmask 7168  }
  0x3b   :  { %99 = vmatpush1.bf16.msra.mxu0 %v399_v3  ;;  %v401_v7 = vld [vmem:[#allocation7] sm:$0xff]   ;;  %367 = vmatprep.subr.bf16.mxu1 %v400_v6  ;;  %v403_v9 = vld [vmem:[#allocation7 + $0x8] sm:$0xff]   ;;  %v404_v10 = vld [vmem:[#allocation7 + $0x50] sm:$0xff]   ;;  %v75_v23 = vshrl.u32 %v74_v22, 7 }
  0x3c   :  { %368 = vmatpush3.bf16.msra.mxu1 %v401_v7  ;;  %v405_v11 = vld [vmem:[#allocation7 + $0x10] sm:$0xff]   ;;  %v406_v12 = vld [vmem:[#allocation7 + $0x58] sm:$0xff]   ;;  %v408_v14 = vld [vmem:[#allocation7 + $0x60] sm:$0xff]  }
  0x3d   :  { %369 = vmatprep.subr.bf16.mxu1 %v402_v8  ;;  %v407_v13 = vld [vmem:[#allocation7 + $0x18] sm:$0xff]   ;;  %v409_v15 = vld [vmem:[#allocation7 + $0x20] sm:$0xff]   ;;  %v410_v16 = vld [vmem:[#allocation7 + $0x68] sm:$0xff]   ;;  %v76_v24 = vsub.s32 0, %v75_v23  ;;  %v80_v26 = vsub.s32 1, %v75_v23 }
  0x3e   :  { %347 = vmatmul.mubr.msk.bf16.vlgmr.msra.gmra.mrb[0].mxu0 %vm94_vm0, %v69_v5  ;;  %v411_v17 = vld [vmem:[#allocation7 + $0x28] sm:$0xff]   ;;  %v412_v18 = vld [vmem:[#allocation7 + $0x70] sm:$0xff]   ;;  %v414_v20 = vld [vmem:[#allocation7 + $0x78] sm:$0xff]  }
  0x3f   :  { %v413_v19 = vld [vmem:[#allocation7 + $0x30] sm:$0xff]   ;;  %v415_v21 = vld [vmem:[#allocation7 + $0x38] sm:$0xff]   ;;  %v72_v25 = vld [vmem:[%s593_s2] sm:$0x3] }
  0x40   :  { %370 = vmatpush3.bf16.msra.mxu1 %v403_v9  ;;  %v77_v27 = vrot.slane %v72_v25, %v76_v24  ;;  %v81_v28 = vrot.slane %v72_v25, %v80_v26  ;;  %v348_v40 = vld [vmem:[%s595_s4] ss:$0 sm:$0xff] }
  0x41   :  { %371 = vmatprep.subr.bf16.mxu1 %v404_v10  ;;  %v365_v46 = vld [vmem:[%s596_s5] ss:$0 sm:$0xff] }
  0x42   :  { %v366_v49 = vld [vmem:[#allocation2] ss:$0 sm:$0xff] }
  0x44   :  { %372 = vmatpush3.bf16.msra.mxu1 %v405_v11 }
  0x45   :  { %373 = vmatprep.subr.bf16.mxu1 %v406_v12 }
  0x48   :  { %374 = vmatpush3.bf16.msra.mxu1 %v407_v13 }
  0x49   :  { %375 = vmatprep.subr.bf16.mxu1 %v408_v14 }
  0x4c   :  { %376 = vmatpush3.bf16.msra.mxu1 %v409_v15 }
  0x4d   :  { %377 = vmatprep.subr.bf16.mxu1 %v410_v16 }
  0x50   :  { %378 = vmatpush3.bf16.msra.mxu1 %v411_v17 }
  0x51   :  { %379 = vmatprep.subr.bf16.mxu1 %v412_v18 }
  0x54   :  { %380 = vmatpush3.bf16.msra.mxu1 %v413_v19 }
  0x55   :  { %381 = vmatprep.subr.bf16.mxu1 %v414_v20 }
  0x58   :  { %382 = vmatpush3.bf16.msra.mxu1 %v415_v21 }
 0x111   :  { %v132_v29 = vpop.f32.mrb[0].mxu0 }
 0x112   :  { %v133_v30 = vadd.f32 %v132_v29, %v77_v27  ;;  %v134_v31 = vpop.f32.mrb[1].mxu0 }
 0x113   :  { %v135_v32 = vadd.f32 %v134_v31, %v81_v28  ;;  %v136_v33 = vpop.f32.mrb[2].mxu0 }
 0x114   :  { %416 = vtanh.f32 %v133_v30  ;;  %v137_v34 = vpop.f32.mrb[3].mxu0 }
 0x115   :  { %418 = vtanh.f32 %v135_v32 }
 0x11e   :  { %v417_v35 = vpop.eup %416 }
 0x11f   :  { %v419_v36 = vpop.eup %418  ;;  %v141_v38 = vpack.c.bf16 %v417_v35, %v417_v35 }
 0x120   :  { %v142_v37 = vpack.c.bf16 %v419_v36, %v419_v36 }
 0x122   :  { %310 = vmatprep.mubr.bf16.mxu1 %v142_v37 }
 0x123   :  { %311 = vmatmul.mubr.bf16.vlgmr.msra.gmra.mrb[0].mxu1 %v141_v38 }
 0x1f6   :  { %v383_v39 = vpop.f32.mrb[0].mxu1 }
 0x1f7   :  { %v384_v41 = vpop.f32.mrb[1].mxu1 }
 0x1f8   :  { %v385_v42 = vadd.f32 %v384_v41, %v383_v39  ;;  %v386_v43 = vpop.f32.mrb[2].mxu1 }
 0x1f9   :  { %v387_v44 = vpop.f32.mrb[3].mxu1 }
 0x1fa   :  { %v313_v45 = vadd.f32 %v385_v42, %v348_v40 }
 0x1fc   :  { %420 = vtanh.f32 %v313_v45 }
 0x206   :  { %v421_v47 = vpop.eup %420 }
 0x207   :  { %v326_v48 = vmul.f32 %v421_v47, %v365_v46 }
 0x209   :  { %327 = vadd.xlane.f32.xlu0 %v326_v48 }
 0x296   :  { %v328_v50 = vpop.xlane.xlu0 %327 }
 0x297   :  { %v336_v51 = vadd.f32 %v366_v49, %v328_v50 }
 0x299   :  { %338 = vst.msk [vmem:[%s598_s7] sm:$0xff] %vm337_vm1, %v336_v51 }
 0x29a   :  { %343 = vsyncpa [#allocation4], 1 }
 0x29b   :  { %344 = vsyncpa [#allocation6], 1 }

</bundles_post_ra>
